<compile_context>
chip_gen: v5e
topology: v5e:2x2
jax: 0.10.0
libtpu: 0.0.40
codegen_flags: <defaults>
</compile_context>

<pallas_src>
import jax
import jax.numpy as jnp
from jax import lax
from jax.experimental import pallas as pl
from jax.experimental.pallas import tpu as pltpu


def _round_up(x, m):
    return ((x + m - 1) // m) * m


def _cdiv(a, b):
    return (a + b - 1) // b


def _vmem_capacity_bytes():
    """Physical VMEM per core; conservative (v7x) fallback if query fails."""
    try:
        cap = getattr(pltpu.get_tpu_info(), "vmem_capacity_bytes", None)
        if cap:
            return int(cap)
    except Exception:
        pass
    return 64 << 20


# -----------------------------------------------------------------------------
# Kernel 1: policy-gradient loss
#   out[b] = (logsumexp(logits[b, :]) - logits[b, action[b]]) * dr[b]
# Layout: logits block (TB, A) (batch on sublanes, actions on lanes, native
# dtype, upcast in-kernel); dr and the output are lane-dense (1, TB) rows;
# action is a (TB, 1) int32 column (tiny).  Both per-row reductions (sum of
# exp, and the picked shifted logit) are produced as lane-major rows by ONE
# MXU matmul: selector(8, 2A) @ [p | q](TB, 2A)^T -> (8, TB); rows 0 / 1 hold
# the two sums.  The selector is a resident input (constant index_map).
# -----------------------------------------------------------------------------
def _policy_loss_kernel(sel_ref, logits_ref, action_ref, dr_ref, out_ref):
    logits = logits_ref[...].astype(jnp.float32)              # (TB, A) upcast on VPU
    tb, a = logits.shape

    m = jnp.max(logits, axis=-1, keepdims=True)                # (TB, 1)
    shifted = logits - m                                        # (TB, A)

    col = lax.broadcasted_iota(jnp.int32, (tb, a), 1)           # (TB, A)
    picked = col == action_ref[...]                             # action: (TB, 1)

    p = jnp.exp(shifted)                                        # (TB, A)
    q = jnp.where(picked, shifted, 0.0)                         # -inf-safe gather
    pq = jnp.concatenate([p, q], axis=-1)                       # (TB, 2A)

    # One MXU matmul produces both lane-major row-sums: red[0,:] = sum(p),
    # red[1,:] = sum(q) = logit[action] - m.
    red = lax.dot_general(
        sel_ref[...], pq, (((1,), (1,)), ((), ())),
        precision=lax.Precision.HIGHEST,
        preferred_element_type=jnp.float32)                     # (8, TB)
    sumexp_row = red[0:1, :]                                     # (1, TB)
    picked_row = red[1:2, :]                                     # (1, TB)

    # loss = (lse - logit_a) * dr = (log(sumexp) - (logit_a - m)) * dr
    out_ref[...] = (jnp.log(sumexp_row) - picked_row) * dr_ref[...]


_CHEAP_PAD_BYTES = 8 << 20   # below this, a host-side pad of logits is negligible


def policy_loss(actions_logits, action, discounted_reward):
    """Pallas equivalent of PolicyNet.loss.

    actions_logits: (B, A) float32/bfloat16 (native dtype, no pre-cast)
    action:         (B,)   integer
    discounted_reward: (B,) float
    returns:        (B,)   float32   (matches torch .view(-1))
    """
    B, A = actions_logits.shape
    itemsize = jnp.dtype(actions_logits.dtype).itemsize
    a_pad = _round_up(A, 128)                     # lane padding of the VMEM block

    # Per-generation budgets: v7x (64 MiB physical VMEM) vs v5e/v6e (128 MiB).
    if _vmem_capacity_bytes() <= (64 << 20):
        logits_block_budget, vmem_limit = (2 << 20), (40 << 20)
    else:
        logits_block_budget, vmem_limit = (6 << 20), (64 << 20)

    # Batch tile: multiple of 128 (lane-dense output blocks), sized by the
    # padded VMEM footprint of a logits block.
    tb = max(128, (logits_block_budget // (a_pad * itemsize)) // 128 * 128)
    b_pad = _round_up(B, 128)
    tb = min(tb, b_pad)
    if b_pad >= 256 and tb >= b_pad:
        # Keep >= 2 grid steps so dimension_semantics=("parallel",) can shard
        # across v7x's 2 TensorCores.
        tb = _round_up(b_pad // 2, 128)

    grid_b = _cdiv(B, tb)
    b_full = grid_b * tb

    # Tiny 1-D operands: pad to a whole number of blocks (negligible cost).
    action_i = action.astype(jnp.int32)
    dr_f = discounted_reward.astype(jnp.float32)
    if b_full != B:
        action_i = jnp.pad(action_i, (0, b_full - B))
        dr_f = jnp.pad(dr_f, (0, b_full - B))
    action_col = action_i.reshape(b_full, 1)      # column layout for the compare
    dr_row = dr_f.reshape(1, b_full)              # lane-dense row

    # Logits: never pad large batches (that would double HBM traffic on a
    # memory-bound kernel) — rely on a partial final block instead.  Small
    # logits take the trivially-cheap pad.
    logits_in = actions_logits
    if b_full != B and B * A * itemsize <= _CHEAP_PAD_BYTES:
        logits_in = jnp.pad(actions_logits, ((0, b_full - B), (0, 0)))

    # Resident selector LHS (row 0 sums p, row 1 sums q).
    sel = jnp.zeros((8, 2 * A), jnp.float32)
    sel = sel.at[0, :A].set(1.0)
    sel = sel.at[1, A:].set(1.0)

    out = pl.pallas_call(
        _policy_loss_kernel,
        out_shape=jax.ShapeDtypeStruct((1, b_full), jnp.float32),
        grid=(grid_b,),
        in_specs=[
            pl.BlockSpec((8, 2 * A), lambda i: (0, 0)),   # selector (resident)
            pl.BlockSpec((tb, A), lambda i: (i, 0)),      # logits, native dtype
            pl.BlockSpec((tb, 1), lambda i: (i, 0)),      # action (int32 column)
            pl.BlockSpec((1, tb), lambda i: (0, i)),      # dr (lane-dense row)
        ],
        out_specs=pl.BlockSpec((1, tb), lambda i: (0, i)),  # lane-dense loss row
        compiler_params=pltpu.CompilerParams(
            dimension_semantics=("parallel",),            # v7x: shard across 2 TCs
            vmem_limit_bytes=vmem_limit,
        ),
    )(sel, logits_in, action_col, dr_row)
    return out.reshape(-1)[:B]


# -----------------------------------------------------------------------------
# Kernel 2: discounted rewards (reverse scan), single grid step.
#   d[t] = r[t] + gamma * d[t+1]
# The whole (1, t_pad) reward row is resident in VMEM; a lax.fori_loop walks
# the C-wide chunks last -> first.  Per chunk (one MXU matmul against the
# precomputed gamma-power matrix U, U[u,v] = gamma^(v-u) for v>=u):
#   d_chunk = r_chunk @ U^T + gamma^(C-u) * carry
# carry (= d at the start of the later chunk) is the (1,1) loop carry.
# -----------------------------------------------------------------------------
def _discounted_rewards_kernel(r_ref, u_ref, g_ref, out_ref):
    c = u_ref.shape[0]
    nchunks = r_ref.shape[1] // c

    def body(j, carry):                                         # carry: (1, 1) f32
        blk = nchunks - 1 - j                                   # reverse time order
        start = pl.multiple_of(blk * c, c)
        r8 = jnp.broadcast_to(r_ref[:, pl.ds(start, c)], (8, c))
        d8 = lax.dot_general(
            r8, u_ref[...], (((1,), (1,)), ((), ())),
            precision=lax.Precision.HIGHEST,
            preferred_element_type=jnp.float32)                 # d8[m,u] = sum_v r[v]*U[u,v]
        d = d8[0:1, :] + g_ref[...] * carry                     # (1, C)
        out_ref[:, pl.ds(start, c)] = d
        return d[:, 0:1]                                        # carry for earlier chunk

    lax.fori_loop(0, nchunks, body, jnp.zeros((1, 1), jnp.float32))


def compute_discounted_rewards(rewards, gamma=0.95, *, chunk=256):
    """Pallas equivalent of PolicyNet.compute_discounted_rewards."""
    T = int(rewards.shape[0])
    C = int(chunk)
    t_pad = _round_up(max(T, 1), C)
    r = rewards.astype(jnp.float32)
    if t_pad != T:
        r = jnp.pad(r, (0, t_pad - T))            # trailing zero rewards: harmless
    r_row = r.reshape(1, t_pad)

    g = jnp.float32(gamma)
    idx = jnp.arange(C, dtype=jnp.int32)
    diff = idx[None, :] - idx[:, None]                            # v - u
    U = jnp.where(diff >= 0,
                  g ** jnp.maximum(diff, 0).astype(jnp.float32),
                  0.0).astype(jnp.float32)                        # (C, C)
    gvec = (g ** (C - idx).astype(jnp.float32)).reshape(1, C)     # carry weights

    # Single grid step: whole arrays resident in VMEM, one lane-dense store.
    out = pl.pallas_call(
        _discounted_rewards_kernel,
        out_shape=jax.ShapeDtypeStruct((1, t_pad), jnp.float32),
        compiler_params=pltpu.CompilerParams(
            vmem_limit_bytes=32 * 1024 * 1024,
        ),
    )(r_row, U, gvec)
    # TODO(synk): for very long horizons a two-level scan (parallel per-chunk
    # prefixes + tiny sequential carry fix-up) would let v7x use both TCs.
    return out.reshape(-1)[:T]


# -----------------------------------------------------------------------------
# Pure-JAX / Python references for verification
# -----------------------------------------------------------------------------
def _loss_ref(logits, action, dr):
    logp = jax.nn.log_softmax(logits.astype(jnp.float32), axis=-1)
    picked = jnp.take_along_axis(logp, action[:, None], axis=-1)[:, 0]
    return -picked * dr


def _disc_ref(rewards, gamma):
    out = []
    running = 0.0
    for r in reversed(list(rewards)):
        running = float(r) + gamma * running
        out.append(running)
    return jnp.array(list(reversed(out)), jnp.float32)


if __name__ == "__main__":
    key = jax.random.PRNGKey(0)
    k1, k2, k3, k4, k5, k6, k7, k8 = jax.random.split(key, 8)

    # -- small shapes matching the module's hot paths --
    B, A, T = 8, 16, 8
    gamma = 0.95
    logits = jax.random.normal(k1, (B, A), dtype=jnp.float32)
    action = jax.random.randint(k2, (B,), 0, A, dtype=jnp.int32)
    disc_reward = jax.random.normal(k3, (B,), dtype=jnp.float32)
    rewards = jax.random.normal(k4, (T,), dtype=jnp.float32)

    loss_out = jax.block_until_ready(policy_loss(logits, action, disc_reward))
    disc_out = jax.block_until_ready(compute_discounted_rewards(rewards, gamma))

    # native-bf16 logits path (no wrapper pre-cast; upcast happens on-chip)
    logits_bf16 = logits.astype(jnp.bfloat16)
    loss_bf16 = jax.block_until_ready(policy_loss(logits_bf16, action, disc_reward))

    # -- larger shapes exercising the multi-block grid and the chunked scan --
    B2, A2, T2 = 600, 10, 300
    logits2 = jax.random.normal(k5, (B2, A2), dtype=jnp.float32)
    action2 = jax.random.randint(k6, (B2,), 0, A2, dtype=jnp.int32)
    dr2 = jax.random.normal(k7, (B2,), dtype=jnp.float32)
    rewards2 = jax.random.normal(k8, (T2,), dtype=jnp.float32)
    loss2 = jax.block_until_ready(policy_loss(logits2, action2, dr2))
    disc2 = jax.block_until_ready(compute_discounted_rewards(rewards2, gamma))

    # -- verify against references --
    assert loss_out.shape == (B,)
    assert jnp.allclose(loss_out, _loss_ref(logits, action, disc_reward),
                        atol=1e-4, rtol=1e-4)
    assert jnp.allclose(loss_bf16,
                        _loss_ref(logits_bf16.astype(jnp.float32), action, disc_reward),
                        atol=1e-4, rtol=1e-4)
    assert jnp.allclose(disc_out, _disc_ref(jax.device_get(rewards), gamma),
                        atol=1e-4, rtol=1e-4)
    assert loss2.shape == (B2,)
    assert jnp.allclose(loss2, _loss_ref(logits2, action2, dr2),
                        atol=1e-4, rtol=1e-4)
    assert jnp.allclose(disc2, _disc_ref(jax.device_get(rewards2), gamma),
                        atol=1e-4, rtol=1e-4)

    print("KERNEL_OK")
</pallas_src>

<mosaic_0001>
module attributes {stable_mosaic.version = 11 : i64} {
  func.func @_policy_loss_kernel(%arg0: i32, %arg1: memref<8x32xf32, #tpu.memory_space<vmem>>, %arg2: memref<128x16xf32, #tpu.memory_space<vmem>>, %arg3: memref<128x1xi32, #tpu.memory_space<vmem>>, %arg4: memref<1x128xf32, #tpu.memory_space<vmem>>, %arg5: memref<1x128xf32, #tpu.memory_space<vmem>>) attributes {dimension_semantics = [#tpu.dimension_semantics<parallel>], iteration_bounds = array<i64: 1>, scalar_prefetch = 0 : i64, scratch_operands = 0 : i64, tpu.core_type = #tpu.core_type<tc>, window_params = [{pipeline_mode = #tpu.pipeline_mode<synchronous>, transform_indices = @transform_0, window_bounds = array<i64: 8, 32>}, {transform_indices = @transform_1, window_bounds = array<i64: 128, 16>}, {transform_indices = @transform_2, window_bounds = array<i64: 128, 1>}, {transform_indices = @transform_3, window_bounds = array<i64: 1, 128>}, {transform_indices = @transform_4, window_bounds = array<i64: 1, 128>}]} {
    %c0 = arith.constant 0 : index
    %c0_0 = arith.constant 0 : index
    %0 = vector.load %arg2[%c0, %c0_0] : memref<128x16xf32, #tpu.memory_space<vmem>>, vector<128x16xf32>
    %cst = arith.constant dense<0xFF800000> : vector<128xf32>
    %1 = vector.multi_reduction <maximumf>, %0, %cst [1] : vector<128x16xf32> to vector<128xf32>
    %2 = vector.shape_cast %1 : vector<128xf32> to vector<128x1xf32>
    %3 = vector.broadcast %2 : vector<128x1xf32> to vector<128x16xf32>
    %4 = arith.subf %0, %3 : vector<128x16xf32>
    %5 = tpu.iota {dimensions = array<i32: 1>} : vector<128x16xi32>
    %c0_1 = arith.constant 0 : index
    %c0_2 = arith.constant 0 : index
    %6 = vector.load %arg3[%c0_1, %c0_2] : memref<128x1xi32, #tpu.memory_space<vmem>>, vector<128x1xi32>
    %7 = vector.broadcast %6 : vector<128x1xi32> to vector<128x16xi32>
    %8 = arith.cmpi eq, %5, %7 : vector<128x16xi32>
    %9 = math.exp %4 : vector<128x16xf32>
    %cst_3 = arith.constant 0.000000e+00 : f32
    %10 = vector.broadcast %cst_3 : f32 to vector<128x16xf32>
    %11 = arith.select %8, %4, %10 : vector<128x16xi1>, vector<128x16xf32>
    %12 = tpu.concatenate %9, %11 in 1 : vector<128x16xf32>, vector<128x16xf32> -> vector<128x32xf32>
    %c0_4 = arith.constant 0 : index
    %c0_5 = arith.constant 0 : index
    %13 = vector.load %arg1[%c0_4, %c0_5] : memref<8x32xf32, #tpu.memory_space<vmem>>, vector<8x32xf32>
    %cst_6 = arith.constant dense<0.000000e+00> : vector<8x128xf32>
    %14 = tpu.matmul %13, %12, %cst_6 {dimension_numbers = #tpu.dot_dimension_numbers<[1], [1], [0], [0], [0, 0, 1, 0], [], []>, precision = #tpu.contract_precision<fp32>} : vector<8x32xf32>, vector<128x32xf32>, vector<8x128xf32> -> vector<8x128xf32>
    %15 = vector.extract_strided_slice %14 {offsets = [0, 0], sizes = [1, 128], strides = [1, 1]} : vector<8x128xf32> to vector<1x128xf32>
    %16 = vector.extract_strided_slice %14 {offsets = [1, 0], sizes = [1, 128], strides = [1, 1]} : vector<8x128xf32> to vector<1x128xf32>
    %17 = math.log %15 : vector<1x128xf32>
    %18 = arith.subf %17, %16 : vector<1x128xf32>
    %c0_7 = arith.constant 0 : index
    %c0_8 = arith.constant 0 : index
    %19 = vector.load %arg4[%c0_7, %c0_8] : memref<1x128xf32, #tpu.memory_space<vmem>>, vector<1x128xf32>
    %20 = arith.mulf %18, %19 : vector<1x128xf32>
    %c0_9 = arith.constant 0 : index
    %c0_10 = arith.constant 0 : index
    %21 = vector.load %arg5[%c0_9, %c0_10] : memref<1x128xf32, #tpu.memory_space<vmem>>, vector<1x128xf32>
    tpu.vector_store %arg5[%c0_9, %c0_10], %20 {strides = array<i32>} : memref<1x128xf32, #tpu.memory_space<vmem>>, vector<1x128xf32>,
    return
  }
  func.func @transform_0(%arg0: i32) -> (i32, i32) {
    %c0_i32 = arith.constant 0 : i32
    %c0_i32_0 = arith.constant 0 : i32
    %c0_i32_1 = arith.constant 0 : i32
    return %c0_i32, %c0_i32_0 : i32, i32
  }
  func.func @transform_1(%arg0: i32) -> (i32, i32) {
    %c0_i32 = arith.constant 0 : i32
    %c0_i32_0 = arith.constant 0 : i32
    return %arg0, %c0_i32 : i32, i32
  }
  func.func @transform_2(%arg0: i32) -> (i32, i32) {
    %c0_i32 = arith.constant 0 : i32
    %c0_i32_0 = arith.constant 0 : i32
    return %arg0, %c0_i32 : i32, i32
  }
  func.func @transform_3(%arg0: i32) -> (i32, i32) {
    %c0_i32 = arith.constant 0 : i32
    %c0_i32_0 = arith.constant 0 : i32
    return %c0_i32, %arg0 : i32, i32
  }
  func.func @transform_4(%arg0: i32) -> (i32, i32) {
    %c0_i32 = arith.constant 0 : i32
    %c0_i32_0 = arith.constant 0 : i32
    return %c0_i32, %arg0 : i32, i32
  }
}

</mosaic_0001>

<bundles_post_ra>
// kernel: tpu_custom_call.1
= control target key start
LH: loop header
LB: loop body
LE: loop exit
PB: predicated region body
PF: predicated region fallthrough
CT: control target
= control target key end

     0   :  { %vm34_vm0 = vcmask 130048   ;;  %v794_v6 = vmov 0   ;;  %s1357_s0 = inlined_call_operand.vmem [shape: f32[8,32], index: 0, kind: input, shape index: {}]   ;;  %s1358_s1 = inlined_call_operand.vmem [shape: f32[128,16], index: 1, kind: input, shape index: {}]   ;;  %s1359_s2 = inlined_call_operand.vmem [shape: s32[128,1], index: 2, kind: input, shape index: {}]   ;;  %s1360_s3 = inlined_call_operand.vmem [shape: f32[1,128], index: 3, kind: input, shape index: {}]   ;;  %s1361_s4 = inlined_call_operand.hbm [shape: f32[1,128], index: 4, kind: output, shape index: {}]  }
   0x1   :  { %v825_v0 = vld [vmem:[%s1358_s1 + $0x78] sm:$0xff]  ;;  %v830_v1 = vld [vmem:[%s1358_s1 + $0x70] sm:$0xff]  ;;  %v835_v2 = vld [vmem:[%s1358_s1 + $0x68] sm:$0xff]  ;;  %731 = vset.pattern.permute.xlu0 %v794_v6  ;;  %732 = vset.pattern.permute.xlu2 %v794_v6 }
   0x2   :  { %v80_v3 = vsel %vm34_vm0, %v825_v0, -inf  ;;  %v77_v4 = vsel %vm34_vm0, %v830_v1, -inf  ;;  %v74_v5 = vsel %vm34_vm0, %v835_v2, -inf  ;;  %733 = vset.pattern.permute.xlu1 %v794_v6 }
   0x3   :  { %81 = vmax.xlane.f32.xlu0 %v80_v3  ;;  %78 = vmax.xlane.f32.xlu1 %v77_v4 }
   0x4   :  { %75 = vmax.xlane.f32.xlu2 %v74_v5 }
   0x5   :  { %9 = vsyncpa [#allocation3], 0  ;;  %v846_v7 = vld [vmem:[%s1358_s1 + $0x58] sm:$0xff]  ;;  %v851_v8 = vld [vmem:[%s1358_s1 + $0x60] sm:$0xff]  ;;  %v99_v41 = vlaneseq  ;;  %s795_s13 = smov 16   ;;  %vm310_vm12 = vcmask 261120  }
   0x6   :  { %v68_v9 = vsel %vm34_vm0, %v846_v7, -inf  ;;  %v71_v10 = vsel %vm34_vm0, %v851_v8, -inf  ;;  %v860_v11 = vld [vmem:[%s1358_s1 + $0x48] sm:$0xff]  ;;  %v865_v12 = vld [vmem:[%s1358_s1 + $0x40] sm:$0xff]  ;;  %v116_v15 = vld [vmem:[%s1359_s2 + $0x78] sm:$0xff]  ;;  %s796_s29 = smov [#allocation2]  }
   0x7   :  { %v62_v13 = vsel %vm34_vm0, %v860_v11, -inf  ;;  %v59_v14 = vsel %vm34_vm0, %v865_v12, -inf  ;;  %v877_v16 = vld [vmem:[%s1358_s1 + $0x38] sm:$0xff]  ;;  %v884_v18 = vld [vmem:[%s1358_s1 + $0x28] sm:$0xff]  ;;  %v111_v21 = vld [vmem:[%s1359_s2 + $0x50] sm:$0xff]  ;;  %v949_v42 = vand.u32 127, %v99_v41 }
   0x8   :  { %v56_v17 = vsel %vm34_vm0, %v877_v16, -inf  ;;  %v50_v19 = vsel %vm34_vm0, %v884_v18, -inf  ;;  %v114_v20 = vld [vmem:[%s1359_s2 + $0x68] sm:$0xff]  ;;  %v115_v22 = vld [vmem:[%s1359_s2 + $0x70] sm:$0xff]  ;;  %v113_v26 = vld [vmem:[%s1359_s2 + $0x60] sm:$0xff]  ;;  %s717_s30 = sshll.u32 %s796_s29, 4  ;;  %s718_s30 = int_to_ptr.vmem [resolvable:$true] %s717_s30 }
   0x9   :  { %v107_v23 = vld [vmem:[%s1359_s2 + $0x30] sm:$0xff]  ;;  %v106_v27 = vld [vmem:[%s1359_s2 + $0x28] sm:$0xff]  ;;  %v105_v31 = vld [vmem:[%s1359_s2 + $0x20] sm:$0xff]  ;;  %s719_s7 = sshll.u32 %s1361_s4, 4  ;;  %s720_s7 = int_to_ptr.hbm [resolvable:$true] %s719_s7 }
   0xa   :  { %v903_v24 = vld [vmem:[%s1358_s1 + $0x50] sm:$0xff]  ;;  %v110_v30 = vld [vmem:[%s1359_s2 + $0x48] sm:$0xff]  ;;  %v929_v32 = vld [vmem:[%s1358_s1 + $0x20] sm:$0xff] }
   0xb   :  { %69 = vmax.xlane.f32.xlu1 %v68_v9  ;;  %v65_v25 = vsel %vm34_vm0, %v903_v24, -inf  ;;  %v916_v28 = vld [vmem:[%s1358_s1 + $0x30] sm:$0xff]  ;;  %v47_v33 = vsel %vm34_vm0, %v929_v32, -inf  ;;  %v112_v34 = vld [vmem:[%s1359_s2 + $0x58] sm:$0xff]  ;;  %v109_v35 = vld [vmem:[%s1359_s2 + $0x40] sm:$0xff] }
   0xc   :  { %72 = vmax.xlane.f32.xlu2 %v71_v10  ;;  %v53_v29 = vsel %vm34_vm0, %v916_v28, -inf  ;;  %v942_v36 = vld [vmem:[%s1358_s1 + $0x18] sm:$0xff]  ;;  %v963_v50 = vld [vmem:[%s1358_s1 + $0x8] sm:$0xff]  ;;  %v981_v62 = vld [vmem:[%s1358_s1 + $0x10] sm:$0xff] }
   0xd   :  { %v108_v37 = vld [vmem:[%s1359_s2 + $0x38] sm:$0xff]  ;;  %v44_v38 = vsel %vm34_vm0, %v942_v36, -inf  ;;  %v38_v51 = vsel %vm34_vm0, %v963_v50, -inf  ;;  %v102_v6 = vld [vmem:[%s1359_s2 + $0x8] sm:$0xff] }
   0xe   :  { %v104_v47 = vld [vmem:[%s1359_s2 + $0x18] sm:$0xff] }
  0x13   :  { %63 = vmax.xlane.f32.xlu1 %v62_v13  ;;  %v101_v13 = vld [vmem:[%s1359_s2] sm:$0xff] }
  0x14   :  { %60 = vmax.xlane.f32.xlu2 %v59_v14 }
  0x17   :  { %163 = vperm.xlu0 %731, %v116_v15  }
  0x1b   :  { %57 = vmax.xlane.f32.xlu1 %v56_v17 }
  0x23   :  { %51 = vmax.xlane.f32.xlu1 %v50_v19 }
  0x2c   :  { %157 = vperm.xlu2 %732, %v114_v20  }
  0x34   :  { %148 = vperm.xlu2 %732, %v111_v21  }
  0x3c   :  { %160 = vperm.xlu1 %733, %v115_v22   ;;  %136 = vperm.xlu2 %732, %v107_v23  }
  0x41   :  { %66 = vmax.xlane.f32.xlu0 %v65_v25 }
  0x44   :  { %154 = vperm.xlu1 %733, %v113_v26   ;;  %133 = vperm.xlu2 %732, %v106_v27  }
  0x49   :  { %54 = vmax.xlane.f32.xlu0 %v53_v29 }
  0x4c   :  { %145 = vperm.xlu1 %733, %v110_v30   ;;  %130 = vperm.xlu2 %732, %v105_v31  }
  0x51   :  { %48 = vmax.xlane.f32.xlu0 %v47_v33 }
  0x65   :  { %151 = vperm.xlu0 %731, %v112_v34   ;;  %v1046_v34 = vld [vmem:[%s1358_s1] sm:$0xff] }
  0x6d   :  { %142 = vperm.xlu0 %731, %v109_v35  }
  0x75   :  { %139 = vperm.xlu0 %731, %v108_v37   ;;  %45 = vmax.xlane.f32.xlu2 %v44_v38 }
  0x76   :  { %v79_v39 = vpop.xlane.xlu1 %78  ;;  %v82_v40 = vpop.xlane.xlu0 %81 }
  0x77   :  { %v952_v43 = vsub.f32 %v825_v0, %v82_v40  ;;  %v76_v49 = vpop.xlane.xlu2 %75  ;;  %v968_v56 = vsub.f32 %v830_v1, %v79_v39  ;;  %v41_v0 = vsel %vm34_vm0, %v981_v62, -inf  ;;  %v103_v1 = vld [vmem:[%s1359_s2 + $0x10] sm:$0xff] }
  0x78   :  { %v974_v59 = vsub.f32 %v835_v2, %v76_v49 }
  0x7d   :  { %39 = vmax.xlane.f32.xlu2 %v38_v51 }
  0x7e   :  { %v70_v44 = vpop.xlane.xlu1 %69 }
  0x7f   :  { %v73_v53 = vpop.xlane.xlu2 %72  ;;  %v1004_v14 = vsub.f32 %v846_v7, %v70_v44 }
  0x80   :  { %v993_v4 = vsub.f32 %v851_v8, %v73_v53  ;;  %v207_v53 = vmul.f32 1.442695, %v974_v59 }
  0x86   :  { %v64_v48 = vpop.xlane.xlu1 %63 }
  0x87   :  { %v61_v55 = vpop.xlane.xlu2 %60 }
  0x88   :  { %v1014_v20 = vsub.f32 %v865_v12, %v61_v55  ;;  %v1024_v12 = vsub.f32 %v860_v11, %v64_v48 }
  0x89   :  { %v164_v45 = vpop.permute.xlu0 %163 }
  0x8a   :  { %vm180_vm1 = vcmp.eq.s32.totalorder %v949_v42, %v164_v45 }
  0x8b   :  { %v228_v46 = vsel %vm180_vm1, %v952_v43, 0.0 }
  0x8c   :  { %275 = vrot.lane.b32.xlu1 %v228_v46, %s795_s13 }
  0x8e   :  { %v58_v52 = vpop.xlane.xlu1 %57 }
  0x8f   :  { %v158_v60 = vpop.permute.xlu2 %157  ;;  %v1035_v30 = vsub.f32 %v877_v16, %v58_v52  ;;  %v35_v16 = vsel %vm34_vm0, %v1046_v34, -inf  ;;  %v209_v52 = vmul.f32 1.442695, %v968_v56 }
  0x90   :  { %vm178_vm3 = vcmp.eq.s32.totalorder %v949_v42, %v158_v60 }
  0x91   :  { %v226_v61 = vsel %vm178_vm3, %v974_v59, 0.0 }
  0x94   :  { %127 = vperm.xlu1 %733, %v104_v47  }
  0x96   :  { %v52_v54 = vpop.xlane.xlu1 %51 }
  0x97   :  { %v149_v9 = vpop.permute.xlu2 %148 }
  0x98   :  { %vm175_vm6 = vcmp.eq.s32.totalorder %v949_v42, %v149_v9 }
  0x9f   :  { %v137_v15 = vpop.permute.xlu2 %136 }
  0xa0   :  { %vm171_vm14 = vcmp.eq.s32.totalorder %v949_v42, %v137_v15 }
  0xa7   :  { %v134_v23 = vpop.permute.xlu2 %133 }
  0xa8   :  { %vm170_vm8 = vcmp.eq.s32.totalorder %v949_v42, %v134_v23 }
  0xae   :  { %v161_v57 = vpop.permute.xlu1 %160 }
  0xaf   :  { %vm179_vm2 = vcmp.eq.s32.totalorder %v949_v42, %v161_v57  ;;  %v131_v31 = vpop.permute.xlu2 %130 }
  0xb0   :  { %v227_v58 = vsel %vm179_vm2, %v968_v56, 0.0  ;;  %vm169_vm11 = vcmp.eq.s32.totalorder %v949_v42, %v131_v31  ;;  %v203_v56 = vmul.f32 1.442695, %v1004_v14 }
  0xb1   :  { %273 = vrot.lane.b32.xlu0 %v227_v58, %s795_s13 }
  0xb4   :  { %v67_v63 = vpop.xlane.xlu0 %66 }
  0xb5   :  { %v1010_v19 = vsub.f32 %v903_v24, %v67_v63  ;;  %v1027_v24 = vsub.f32 %v884_v18, %v52_v54  ;;  %v211_v18 = vmul.f32 1.442695, %v952_v43 }
  0xb6   :  { %v155_v2 = vpop.permute.xlu1 %154 }
  0xb7   :  { %vm177_vm4 = vcmp.eq.s32.totalorder %v949_v42, %v155_v2  ;;  %v223_v22 = vsel %vm175_vm6, %v1010_v19, 0.0  ;;  %v218_v26 = vsel %vm170_vm8, %v1027_v24, 0.0  ;;  %734 = vpow2.f32 %v211_v18 }
  0xb8   :  { %v225_v5 = vsel %vm177_vm4, %v993_v4, 0.0  ;;  %736 = vpow2.f32 %v209_v52 }
  0xb9   :  { %271 = vrot.lane.b32.xlu0 %v226_v61, %s795_s13  ;;  %738 = vpow2.f32 %v207_v53 }
  0xba   :  { %740 = vpow2.f32 %v203_v56 }
  0xbc   :  { %v990_v3 = vpop.xlane.xlu0 %54 }
  0xbd   :  { %v735_v37 = vpop.eup %734 }
  0xbe   :  { %42 = vmax.xlane.f32.xlu1 %v41_v0  ;;  %v146_v25 = vpop.permute.xlu1 %145  ;;  %v737_v54 = vpop.eup %736 }
  0xbf   :  { %vm174_vm9 = vcmp.eq.s32.totalorder %v949_v42, %v146_v25  ;;  %v739_v63 = vpop.eup %738  ;;  %v199_v25 = vmul.f32 1.442695, %v1024_v12 }
  0xc0   :  { %v222_v27 = vsel %vm174_vm9, %v1024_v12, 0.0 }
  0xc1   :  { %124 = vperm.xlu0 %731, %v103_v1  }
  0xc4   :  { %v49_v10 = vpop.xlane.xlu0 %48 }
  0xc5   :  { %v1041_v33 = vsub.f32 %v929_v32, %v49_v10  ;;  %v205_v10 = vmul.f32 1.442695, %v993_v4 }
  0xc7   :  { %v217_v35 = vsel %vm169_vm11, %v1041_v33, 0.0  ;;  %742 = vpow2.f32 %v205_v10 }
  0xc9   :  { %269 = vrot.lane.b32.xlu0 %v225_v5, %s795_s13 }
  0xd1   :  { %121 = vperm.xlu0 %731, %v102_v6  }
  0xd7   :  { %v152_v8 = vpop.permute.xlu0 %151  ;;  %118 = vperm.xlu1 %733, %v101_v13  }
  0xd8   :  { %vm176_vm5 = vcmp.eq.s32.totalorder %v949_v42, %v152_v8 }
  0xd9   :  { %v224_v17 = vsel %vm176_vm5, %v1004_v14, 0.0  ;;  %v201_v14 = vmul.f32 1.442695, %v1010_v19 }
  0xda   :  { %267 = vrot.lane.b32.xlu2 %v224_v17, %s795_s13 }
  0xdb   :  { %744 = vpow2.f32 %v201_v14 }
  0xdc   :  { %746 = vpow2.f32 %v199_v25 }
  0xdf   :  { %v143_v21 = vpop.permute.xlu0 %142 }
  0xe0   :  { %vm173_vm7 = vcmp.eq.s32.totalorder %v949_v42, %v143_v21  ;;  %v741_v21 = vpop.eup %740 }
  0xe1   :  { %v221_v7 = vsel %vm173_vm7, %v1014_v20, 0.0 }
  0xe2   :  { %261 = vrot.lane.b32.xlu1 %v221_v7, %s795_s13  ;;  %265 = vrot.lane.b32.xlu2 %v223_v22, %s795_s13 }
  0xe7   :  { %v140_v29 = vpop.permute.xlu0 %139 }
  0xe8   :  { %vm172_vm10 = vcmp.eq.s32.totalorder %v949_v42, %v140_v29  ;;  %v46_v41 = vpop.xlane.xlu2 %45 }
  0xe9   :  { %v220_v11 = vsel %vm172_vm10, %v1035_v30, 0.0  ;;  %v1063_v44 = vsub.f32 %v942_v36, %v46_v41  ;;  %v1075_v36 = vsub.f32 %v916_v28, %v990_v3  ;;  %v195_v41 = vmul.f32 1.442695, %v1035_v30 }
  0xea   :  { %255 = vrot.lane.b32.xlu1 %v218_v26, %s795_s13  ;;  %263 = vrot.lane.b32.xlu2 %v222_v27, %s795_s13  ;;  %v743_v27 = vpop.eup %742 }
  0xeb   :  { %v219_v51 = vsel %vm171_vm14, %v1075_v36, 0.0  ;;  %748 = vpow2.f32 %v195_v41 }
  0xf0   :  { %v40_v59 = vpop.xlane.xlu2 %39 }
  0xf2   :  { %259 = vrot.lane.b32.xlu2 %v220_v11, %s795_s13  ;;  %v745_v11 = vpop.eup %744 }
  0xf3   :  { %v747_v52 = vpop.eup %746 }
  0xfa   :  { %253 = vrot.lane.b32.xlu2 %v217_v35, %s795_s13 }
  0xfb   :  { %36 = vmax.xlane.f32.xlu0 %v35_v16 }
  0xfe   :  { %v276_v32 = vpop.permute.xlu1 %275 }
  0xff   :  { %v308_v38 = vsel %vm34_vm0, %v735_v37, %v276_v32 }
 0x100   :  { %v360_v39 = vsel %vm310_vm12, %v308_v38, 0 }
 0x101   :  { %v1055_v40 = vand.u32 4294901760, %v360_v39 }
 0x103   :  { %v1058_v43 = vsub.f32 %v360_v39, %v1055_v40  ;;  %363 = vmatpush.xpose.msra.mxu0 %v1055_v40  ;;  %559 = vmatpush.xpose.msra.mxu3 %v1055_v40 }
 0x105   :  { %506 = vmatpush.xpose.msra.mxu2 %v1058_v43  ;;  %v405_v45 = vand.u32 4294901760, %v1058_v43 }
 0x106   :  { %v128_v46 = vpop.permute.xlu1 %127 }
 0x107   :  { %vm168_vm13 = vcmp.eq.s32.totalorder %v949_v42, %v128_v46  ;;  %v406_v47 = vsub.f32 %v1058_v43, %v405_v45  ;;  %v1142_v46 = vsub.f32 %v963_v50, %v40_v59  ;;  %v309_v43 = vld [vmem:[%s1357_s0] sm:$0xff] }
 0x108   :  { %v216_v48 = vsel %vm168_vm13, %v1063_v44, 0.0 }
 0x109   :  { %251 = vrot.lane.b32.xlu1 %v216_v48, %s795_s13  ;;  %v407_v49 = vand.u32 4294901760, %v406_v47 }
 0x10b   :  { %408 = vmatpush.xpose.msra.mxu1 %v407_v49 }
 0x10f   :  { %257 = vrot.lane.b32.xlu0 %v219_v51, %s795_s13 }
 0x123   :  { %v274_v55 = vpop.permute.xlu0 %273 }
 0x124   :  { %v307_v57 = vsel %vm34_vm0, %v737_v54, %v274_v55 }
 0x125   :  { %v357_v28 = vsel %vm310_vm12, %v307_v57, 0 }
 0x126   :  { %v1084_v58 = vand.u32 4294901760, %v357_v28 }
 0x128   :  { %v1087_v60 = vsub.f32 %v357_v28, %v1084_v58  ;;  %365 = vmatpush.xpose.msra.mxu0 %v1084_v58  ;;  %561 = vmatpush.xpose.msra.mxu3 %v1084_v58 }
 0x12a   :  { %509 = vmatpush.xpose.msra.mxu2 %v1087_v60  ;;  %v411_v61 = vand.u32 4294901760, %v1087_v60 }
 0x12b   :  { %v272_v0 = vpop.permute.xlu0 %271 }
 0x12c   :  { %v306_v1 = vsel %vm34_vm0, %v739_v63, %v272_v0  ;;  %v412_v2 = vsub.f32 %v1087_v60, %v411_v61  ;;  %v197_v0 = vmul.f32 1.442695, %v1014_v20 }
 0x12d   :  { %v354_v3 = vsel %vm310_vm12, %v306_v1, 0 }
 0x12e   :  { %v1099_v5 = vand.u32 4294901760, %v354_v3  ;;  %v413_v6 = vand.u32 4294901760, %v412_v2  ;;  %750 = vpow2.f32 %v197_v0 }
 0x130   :  { %v1102_v9 = vsub.f32 %v354_v3, %v1099_v5  ;;  %367 = vmatpush.xpose.msra.mxu0 %v1099_v5  ;;  %414 = vmatpush.xpose.msra.mxu1 %v413_v6  ;;  %v749_v3 = vpop.eup %748 }
 0x131   :  { %563 = vmatpush.xpose.msra.mxu3 %v1099_v5  ;;  %v43_v13 = vpop.xlane.xlu1 %42 }
 0x132   :  { %512 = vmatpush.xpose.msra.mxu2 %v1102_v9  ;;  %v1110_v8 = vsub.f32 %v981_v62, %v43_v13  ;;  %v417_v15 = vand.u32 4294901760, %v1102_v9 }
 0x133   :  { %v125_v17 = vpop.permute.xlu0 %124 }
 0x134   :  { %vm167_vm15 = vcmp.eq.s32.totalorder %v949_v42, %v125_v17  ;;  %v268_v7 = vpop.permute.xlu2 %267  ;;  %v418_v4 = vsub.f32 %v1102_v9, %v417_v15 }
 0x135   :  { %v215_v22 = vsel %vm167_vm15, %v1110_v8, 0.0  ;;  %v304_v19 = vsel %vm34_vm0, %v741_v21, %v268_v7 }
 0x136   :  { %249 = vrot.lane.b32.xlu2 %v215_v22, %s795_s13  ;;  %v419_v62 = vand.u32 4294901760, %v418_v4  ;;  %v348_v23 = vsel %vm310_vm12, %v304_v19, 0  ;;  %v751_v22 = vpop.eup %750 }
 0x137   :  { %v1122_v26 = vand.u32 4294901760, %v348_v23 }
 0x138   :  { %420 = vmatpush.xpose.msra.mxu1 %v419_v62 }
 0x139   :  { %v1128_v37 = vsub.f32 %v348_v23, %v1122_v26 }
 0x13b   :  { %v270_v29 = vpop.permute.xlu0 %269  ;;  %v429_v49 = vand.u32 4294901760, %v1128_v37 }
 0x13c   :  { %v305_v18 = vsel %vm34_vm0, %v743_v27, %v270_v29  ;;  %v266_v31 = vpop.permute.xlu2 %265 }
 0x13d   :  { %v351_v16 = vsel %vm310_vm12, %v305_v18, 0  ;;  %v303_v35 = vsel %vm34_vm0, %v745_v11, %v266_v31  ;;  %v430_v28 = vsub.f32 %v1128_v37, %v429_v49 }
 0x13e   :  { %v1130_v32 = vand.u32 4294901760, %v351_v16  ;;  %v345_v12 = vsel %vm310_vm12, %v303_v35, 0 }
 0x13f   :  { %v1133_v38 = vand.u32 4294901760, %v345_v12  ;;  %v431_v1 = vand.u32 4294901760, %v430_v28 }
 0x140   :  { %v1136_v39 = vsub.f32 %v351_v16, %v1130_v32  ;;  %369 = vmatpush.xpose.msra.mxu0 %v1130_v32  ;;  %565 = vmatpush.xpose.msra.mxu3 %v1130_v32 }
 0x141   :  { %v1145_v47 = vsub.f32 %v345_v12, %v1133_v38 }
 0x142   :  { %515 = vmatpush.xpose.msra.mxu2 %v1136_v39  ;;  %v423_v48 = vand.u32 4294901760, %v1136_v39 }
 0x143   :  { %v122_v51 = vpop.permute.xlu0 %121  ;;  %v435_v56 = vand.u32 4294901760, %v1145_v47 }
 0x144   :  { %vm166_vm1 = vcmp.eq.s32.totalorder %v949_v42, %v122_v51  ;;  %371 = vmatpush.xpose.msra.mxu0 %v1122_v26  ;;  %567 = vmatpush.xpose.msra.mxu3 %v1122_v26  ;;  %v264_v30 = vpop.permute.xlu2 %263  ;;  %v424_v50 = vsub.f32 %v1136_v39, %v423_v48  ;;  %v191_v51 = vmul.f32 1.442695, %v1027_v24 }
 0x145   :  { %v214_v53 = vsel %vm166_vm1, %v1142_v46, 0.0  ;;  %v302_v54 = vsel %vm34_vm0, %v747_v52, %v264_v30  ;;  %v436_v2 = vsub.f32 %v1145_v47, %v435_v56 }
 0x146   :  { %v342_v55 = vsel %vm310_vm12, %v302_v54, 0  ;;  %518 = vmatpush.xpose.msra.mxu2 %v1128_v37  ;;  %247 = vrot.lane.b32.xlu0 %v214_v53, %s795_s13  ;;  %v425_v57 = vand.u32 4294901760, %v424_v50  ;;  %752 = vpow2.f32 %v191_v51  ;;  %v189_v50 = vmul.f32 1.442695, %v1041_v33 }
 0x147   :  { %v1165_v59 = vand.u32 4294901760, %v342_v55  ;;  %v437_v20 = vand.u32 4294901760, %v436_v2  ;;  %v193_v53 = vmul.f32 1.442695, %v1075_v36  ;;  %v187_v54 = vmul.f32 1.442695, %v1063_v44 }
 0x148   :  { %373 = vmatpush.xpose.msra.mxu0 %v1133_v38  ;;  %426 = vmatpush.xpose.msra.mxu1 %v425_v57  ;;  %754 = vpow2.f32 %v189_v50 }
 0x149   :  { %v1169_v63 = vsub.f32 %v342_v55, %v1165_v59  ;;  %569 = vmatpush.xpose.msra.mxu3 %v1133_v38  ;;  %v119_v10 = vpop.permute.xlu1 %118  ;;  %756 = vpow2.f32 %v193_v53 }
 0x14a   :  { %521 = vmatpush.xpose.msra.mxu2 %v1145_v47  ;;  %vm165_vm2 = vcmp.eq.s32.totalorder %v949_v42, %v119_v10  ;;  %758 = vpow2.f32 %v187_v54 }
 0x14b   :  { %v441_v6 = vand.u32 4294901760, %v1169_v63 }
 0x14c   :  { %375 = vmatpush.xpose.msra.mxu0 %v1165_v59  ;;  %432 = vmatpush.xpose.msra.mxu1 %v431_v1  ;;  %v260_v13 = vpop.permute.xlu2 %259  ;;  %v753_v57 = vpop.eup %752 }
 0x14d   :  { %571 = vmatpush.xpose.msra.mxu3 %v1165_v59  ;;  %v300_v14 = vsel %vm34_vm0, %v749_v3, %v260_v13  ;;  %v442_v17 = vsub.f32 %v1169_v63, %v441_v6 }
 0x14e   :  { %524 = vmatpush.xpose.msra.mxu2 %v1169_v63  ;;  %v336_v21 = vsel %vm310_vm12, %v300_v14, 0  ;;  %v755_v42 = vpop.eup %754 }
 0x14f   :  { %v443_v7 = vand.u32 4294901760, %v442_v17  ;;  %v1186_v4 = vand.u32 4294901760, %v336_v21  ;;  %v757_v2 = vpop.eup %756 }
 0x150   :  { %438 = vmatpush.xpose.msra.mxu1 %v437_v20  ;;  %v759_v36 = vpop.eup %758 }
 0x151   :  { %v1191_v25 = vsub.f32 %v336_v21, %v1186_v4 }
 0x153   :  { %v453_v18 = vand.u32 4294901760, %v1191_v25 }
 0x154   :  { %v262_v19 = vpop.permute.xlu1 %261  ;;  %444 = vmatpush.xpose.msra.mxu1 %v443_v7 }
 0x155   :  { %v301_v62 = vsel %vm34_vm0, %v751_v22, %v262_v19  ;;  %v454_v35 = vsub.f32 %v1191_v25, %v453_v18  ;;  %v185_v22 = vmul.f32 1.442695, %v1110_v8 }
 0x156   :  { %v339_v23 = vsel %vm310_vm12, %v301_v62, 0 }
 0x157   :  { %v1193_v27 = vand.u32 4294901760, %v339_v23  ;;  %v455_v12 = vand.u32 4294901760, %v454_v35  ;;  %760 = vpow2.f32 %v185_v22 }
 0x159   :  { %v1196_v29 = vsub.f32 %v339_v23, %v1193_v27  ;;  %377 = vmatpush.xpose.msra.mxu0 %v1193_v27  ;;  %573 = vmatpush.xpose.msra.mxu3 %v1193_v27 }
 0x15b   :  { %527 = vmatpush.xpose.msra.mxu2 %v1196_v29  ;;  %v447_v11 = vand.u32 4294901760, %v1196_v29 }
 0x15c   :  { %v256_v55 = vpop.permute.xlu1 %255 }
 0x15d   :  { %379 = vmatpush.xpose.msra.mxu0 %v1186_v4  ;;  %575 = vmatpush.xpose.msra.mxu3 %v1186_v4  ;;  %v448_v31 = vsub.f32 %v1196_v29, %v447_v11  ;;  %v298_v24 = vsel %vm34_vm0, %v753_v57, %v256_v55 }
 0x15e   :  { %v330_v28 = vsel %vm310_vm12, %v298_v24, 0 }
 0x15f   :  { %530 = vmatpush.xpose.msra.mxu2 %v1191_v25  ;;  %v449_v16 = vand.u32 4294901760, %v448_v31  ;;  %v1225_v33 = vand.u32 4294901760, %v330_v28 }
 0x161   :  { %450 = vmatpush.xpose.msra.mxu1 %v449_v16  ;;  %v1234_v17 = vsub.f32 %v330_v28, %v1225_v33 }
 0x163   :  { %v465_v16 = vand.u32 4294901760, %v1234_v17 }
 0x165   :  { %456 = vmatpush.xpose.msra.mxu1 %v455_v12 }
 0x16e   :  { %v37_v41 = vpop.xlane.xlu0 %36 }
 0x16f   :  { %v1214_v52 = vsub.f32 %v1046_v34, %v37_v41  ;;  %v254_v34 = vpop.permute.xlu2 %253  ;;  %v466_v41 = vsub.f32 %v1234_v17, %v465_v16 }
 0x170   :  { %v297_v0 = vsel %vm34_vm0, %v755_v42, %v254_v34 }
 0x171   :  { %v213_v30 = vsel %vm165_vm2, %v1214_v52, 0.0  ;;  %v327_v3 = vsel %vm310_vm12, %v297_v0, 0  ;;  %v467_v53 = vand.u32 4294901760, %v466_v41 }
 0x172   :  { %245 = vrot.lane.b32.xlu1 %v213_v30, %s795_s13  ;;  %v1231_v20 = vand.u32 4294901760, %v327_v3  ;;  %v761_v30 = vpop.eup %760 }
 0x174   :  { %v1246_v62 = vsub.f32 %v327_v3, %v1231_v20 }
 0x176   :  { %v471_v51 = vand.u32 4294901760, %v1246_v62 }
 0x178   :  { %v472_v54 = vsub.f32 %v1246_v62, %v471_v51 }
 0x17a   :  { %v473_v42 = vand.u32 4294901760, %v472_v54 }
 0x17b   :  { %v252_v1 = vpop.permute.xlu1 %251 }
 0x17c   :  { %v296_v10 = vsel %vm34_vm0, %v759_v36, %v252_v1 }
 0x17d   :  { %v324_v7 = vsel %vm310_vm12, %v296_v10, 0 }
 0x17e   :  { %v1248_v23 = vand.u32 4294901760, %v324_v7 }
 0x180   :  { %v1259_v35 = vsub.f32 %v324_v7, %v1248_v23 }
 0x181   :  { %v258_v44 = vpop.permute.xlu0 %257 }
 0x182   :  { %v299_v13 = vsel %vm34_vm0, %v757_v2, %v258_v44  ;;  %v477_v55 = vand.u32 4294901760, %v1259_v35  ;;  %v183_v44 = vmul.f32 1.442695, %v1142_v46  ;;  %v181_v46 = vmul.f32 1.442695, %v1214_v52 }
 0x183   :  { %v333_v14 = vsel %vm310_vm12, %v299_v13, 0 }
 0x184   :  { %v1236_v21 = vand.u32 4294901760, %v333_v14  ;;  %v478_v28 = vsub.f32 %v1259_v35, %v477_v55  ;;  %762 = vpow2.f32 %v183_v44 }
 0x185   :  { %764 = vpow2.f32 %v181_v46 }
 0x186   :  { %v1241_v19 = vsub.f32 %v333_v14, %v1236_v21  ;;  %381 = vmatpush.xpose.msra.mxu0 %v1236_v21  ;;  %577 = vmatpush.xpose.msra.mxu3 %v1236_v21  ;;  %v479_v2 = vand.u32 4294901760, %v478_v28 }
 0x188   :  { %533 = vmatpush.xpose.msra.mxu2 %v1241_v19  ;;  %v459_v31 = vand.u32 4294901760, %v1241_v19 }
 0x18a   :  { %383 = vmatpush.xpose.msra.mxu0 %v1225_v33  ;;  %579 = vmatpush.xpose.msra.mxu3 %v1225_v33  ;;  %v460_v8 = vsub.f32 %v1241_v19, %v459_v31  ;;  %v763_v10 = vpop.eup %762 }
 0x18c   :  { %536 = vmatpush.xpose.msra.mxu2 %v1234_v17  ;;  %v461_v12 = vand.u32 4294901760, %v460_v8 }
 0x18e   :  { %385 = vmatpush.xpose.msra.mxu0 %v1231_v20  ;;  %462 = vmatpush.xpose.msra.mxu1 %v461_v12 }
 0x18f   :  { %581 = vmatpush.xpose.msra.mxu3 %v1231_v20 }
 0x190   :  { %v250_v50 = vpop.permute.xlu2 %249  ;;  %539 = vmatpush.xpose.msra.mxu2 %v1246_v62 }
 0x191   :  { %v295_v57 = vsel %vm34_vm0, %v761_v30, %v250_v50  ;;  %v765_v50 = vpop.eup %764 }
 0x192   :  { %v321_v24 = vsel %vm310_vm12, %v295_v57, 0  ;;  %387 = vmatpush.xpose.msra.mxu0 %v1248_v23  ;;  %468 = vmatpush.xpose.msra.mxu1 %v467_v53 }
 0x193   :  { %v1276_v34 = vand.u32 4294901760, %v321_v24  ;;  %583 = vmatpush.xpose.msra.mxu3 %v1248_v23 }
 0x194   :  { %542 = vmatpush.xpose.msra.mxu2 %v1259_v35 }
 0x195   :  { %v1284_v0 = vsub.f32 %v321_v24, %v1276_v34 }
 0x196   :  { %389 = vmatpush.xpose.msra.mxu0 %v1276_v34  ;;  %474 = vmatpush.xpose.msra.mxu1 %v473_v42 }
 0x197   :  { %585 = vmatpush.xpose.msra.mxu3 %v1276_v34  ;;  %v483_v1 = vand.u32 4294901760, %v1284_v0 }
 0x198   :  { %545 = vmatpush.xpose.msra.mxu2 %v1284_v0 }
 0x199   :  { %v484_v36 = vsub.f32 %v1284_v0, %v483_v1 }
 0x19a   :  { %480 = vmatpush.xpose.msra.mxu1 %v479_v2 }
 0x19b   :  { %v485_v3 = vand.u32 4294901760, %v484_v36 }
 0x19e   :  { %486 = vmatpush.xpose.msra.mxu1 %v485_v3 }
 0x1b8   :  { %v248_v13 = vpop.permute.xlu0 %247 }
 0x1b9   :  { %v294_v14 = vsel %vm34_vm0, %v763_v10, %v248_v13 }
 0x1ba   :  { %v318_v7 = vsel %vm310_vm12, %v294_v14, 0 }
 0x1bb   :  { %v1296_v22 = vand.u32 4294901760, %v318_v7 }
 0x1bd   :  { %v488_v8 = vsub.f32 %v318_v7, %v1296_v22  ;;  %391 = vmatpush.xpose.msra.mxu0 %v1296_v22  ;;  %587 = vmatpush.xpose.msra.mxu3 %v1296_v22 }
 0x1bf   :  { %548 = vmatpush.xpose.msra.mxu2 %v488_v8  ;;  %v489_v12 = vand.u32 4294901760, %v488_v8 }
 0x1c1   :  { %v490_v41 = vsub.f32 %v488_v8, %v489_v12 }
 0x1c3   :  { %v491_v30 = vand.u32 4294901760, %v490_v41 }
 0x1c5   :  { %492 = vmatpush.xpose.msra.mxu1 %v491_v30 }
 0x1e4   :  { %v246_v53 = vpop.permute.xlu1 %245 }
 0x1e5   :  { %v293_v54 = vsel %vm34_vm0, %v765_v50, %v246_v53 }
 0x1e6   :  { %v315_v57 = vsel %vm310_vm12, %v293_v54, 0 }
 0x1e7   :  { %v392_v24 = vand.u32 4294901760, %v315_v57 }
 0x1e9   :  { %v494_v42 = vsub.f32 %v315_v57, %v392_v24  ;;  %393 = vmatpush.xpose.msra.mxu0 %v392_v24  ;;  %589 = vmatpush.xpose.msra.mxu3 %v392_v24 }
 0x1eb   :  { %551 = vmatpush.xpose.msra.mxu2 %v494_v42  ;;  %v495_v28 = vand.u32 4294901760, %v494_v42 }
 0x1ed   :  { %600 = vmatpush.xpose.msrb.mxu0 %v405_v45  ;;  %v496_v2 = vsub.f32 %v494_v42, %v495_v28  ;;  %v312_v45 = vsel %vm310_vm12, %v309_v43, 0 }
 0x1ee   :  { %v394_v60 = vand.u32 4294901760, %v312_v45 }
 0x1ef   :  { %v497_v52 = vand.u32 4294901760, %v496_v2 }
 0x1f1   :  { %604 = vmatpush.xpose.msrb.mxu0 %v411_v61  ;;  %498 = vmatpush.xpose.msra.mxu1 %v497_v52 }
 0x1f4   :  { %500 = vmatmul.f32.vlgmr.msra.gmra.mxu1 %v394_v60 }
 0x1f5   :  { %608 = vmatpush.xpose.msrb.mxu0 %v417_v15  ;;  %667 = vmatpush.xpose.msrb.mxu1 %v1055_v40  ;;  %v395_v40 = vsub.f32 %v312_v45, %v394_v60 }
 0x1f7   :  { %554 = vmatmul.f32.vlgmr.msra.gmra.mxu2 %v395_v40 }
 0x1f9   :  { %612 = vmatpush.xpose.msrb.mxu0 %v423_v48  ;;  %669 = vmatpush.xpose.msrb.mxu1 %v1084_v58  ;;  %v396_v58 = vand.u32 4294901760, %v395_v40 }
 0x1fb   :  { %v397_v61 = vsub.f32 %v395_v40, %v396_v58  ;;  %593 = vmatmul.f32.vlgmr.msra.gmra.mxu3 %v396_v58 }
 0x1fd   :  { %616 = vmatpush.xpose.msrb.mxu0 %v429_v49  ;;  %671 = vmatpush.xpose.msrb.mxu1 %v1099_v5  ;;  %v398_v5 = vand.u32 4294901760, %v397_v61 }
 0x1ff   :  { %399 = vmatmul.f32.vlgmr.msra.gmra.mxu0 %v398_v5 }
 0x201   :  { %620 = vmatpush.xpose.msrb.mxu0 %v435_v56  ;;  %673 = vmatpush.xpose.msrb.mxu1 %v1130_v32 }
 0x205   :  { %624 = vmatpush.xpose.msrb.mxu0 %v441_v6  ;;  %675 = vmatpush.xpose.msrb.mxu1 %v1122_v26 }
 0x209   :  { %628 = vmatpush.xpose.msrb.mxu0 %v447_v11  ;;  %677 = vmatpush.xpose.msrb.mxu1 %v1133_v38 }
 0x20d   :  { %632 = vmatpush.xpose.msrb.mxu0 %v453_v18  ;;  %679 = vmatpush.xpose.msrb.mxu1 %v1165_v59 }
 0x211   :  { %636 = vmatpush.xpose.msrb.mxu0 %v459_v31  ;;  %681 = vmatpush.xpose.msrb.mxu1 %v1193_v27 }
 0x215   :  { %640 = vmatpush.xpose.msrb.mxu0 %v465_v16  ;;  %683 = vmatpush.xpose.msrb.mxu1 %v1186_v4  ;;  %v709_v4 = vld [vmem:[%s1360_s3] sm:$0x1] }
 0x219   :  { %644 = vmatpush.xpose.msrb.mxu0 %v471_v51  ;;  %685 = vmatpush.xpose.msrb.mxu1 %v1236_v21 }
 0x21d   :  { %648 = vmatpush.xpose.msrb.mxu0 %v477_v55  ;;  %687 = vmatpush.xpose.msrb.mxu1 %v1225_v33 }
 0x221   :  { %652 = vmatpush.xpose.msrb.mxu0 %v483_v1  ;;  %689 = vmatpush.xpose.msrb.mxu1 %v1231_v20 }
 0x225   :  { %656 = vmatpush.xpose.msrb.mxu0 %v489_v12  ;;  %691 = vmatpush.xpose.msrb.mxu1 %v1248_v23 }
 0x229   :  { %660 = vmatpush.xpose.msrb.mxu0 %v495_v28  ;;  %693 = vmatpush.xpose.msrb.mxu1 %v1276_v34 }
 0x22c   :  { %662 = vmatmul.f32.vlgmr.msrb.gmra.mxu0 %v394_v60 }
 0x22d   :  { %695 = vmatpush.xpose.msrb.mxu1 %v1296_v22 }
 0x231   :  { %697 = vmatpush.xpose.msrb.mxu1 %v392_v24 }
 0x234   :  { %699 = vmatmul.f32.vlgmr.msrb.gmra.mxu1 %v394_v60 }
 0x271   :  { %v501_v9 = vpop.f32.mrf.mxu1 }
 0x27a   :  { %v555_v37 = vpop.f32.mrf.mxu2 }
 0x27c   :  { %v400_v15 = vpop.f32.mrf.mxu0 }
 0x27d   :  { %v502_v26 = vadd.f32 %v501_v9, %v400_v15 }
 0x27e   :  { %v594_v38 = vpop.f32.mrf.mxu3 }
 0x27f   :  { %v556_v32 = vadd.f32 %v555_v37, %v502_v26 }
 0x281   :  { %v595_v39 = vadd.f32 %v594_v38, %v556_v32 }
 0x2a9   :  { %v663_v47 = vpop.f32.mrf.mxu0 }
 0x2aa   :  { %v664_v48 = vadd.f32 %v663_v47, %v595_v39 }
 0x2b1   :  { %v700_v49 = vpop.f32.mrf.mxu1 }
 0x2b2   :  { %v701_v56 = vadd.f32 %v700_v49, %v664_v48 }
 0x2b4   :  { %766 = vlog2.f32 %v701_v56  ;;  %v706_v6 = vrot.slane %v701_v56, 1 }
 0x2ba   :  { %v767_v59 = vpop.eup %766 }
 0x2bb   :  { %v704_v63 = vmul.f32 0.6931472, %v767_v59 }
 0x2bd   :  { %v708_v25 = vsub.f32 %v704_v63, %v706_v6 }
 0x2bf   :  { %v710_v27 = vmul.f32 %v709_v4, %v708_v25 }
 0x2c1   :  { %711 = vst [vmem:[#allocation2] sm:$0x1] %v710_v27 }
 0x2c2   :  { %722 = dma.vmem_to_hbm [thread:$0]  %s718_s30, 16, %s720_s7, [#allocation3]  }
 0x2c3   :  { %792 = dma.done.wait [#allocation3], 16  }
 0x2c4   :  { %793 = vsyncadd [#allocation3], 4294967280 }
 0x2c5   :  { %727 = vsyncpa [#allocation3], 1 }

</bundles_post_ra>
